<compile_context>
chip_gen: v5e
topology: v5e:2x2
jax: 0.10.0
libtpu: 0.0.40
codegen_flags: <defaults>
</compile_context>

<pallas_src>
import math

import jax
import jax.numpy as jnp
import numpy as np
from jax import lax
from jax.experimental import pallas as pl
from jax.experimental.pallas import tpu as pltpu


def _bilstm_sum_kernel(xw_ref, whh_ref, out_ref):
    # xw_ref:  (T, B, 8H)  precomputed input projection + bias, time-major,
    #                      columns = [gate(i,f,g,o)][dir(fwd,bwd)][h];
    #                      backward columns are already time-reversed.
    # whh_ref: (2H, 8H)    block-diagonal hidden->hidden weights, rows = [h_f ; h_b].
    # out_ref: (B, 2H)     sum over time of [h_fwd | h_bwd].
    T, B, _ = xw_ref.shape
    H2 = whh_ref.shape[0]          # 2H (both directions stacked)

    whh = whh_ref[...]             # hoisted: loaded once, reused every step

    def step(t, carry):
        h, c, s = carry
        # One fused matmul per timestep: (B, 2H) x (2H, 8H) -> (B, 8H) = 128 lanes.
        gates = xw_ref[t] + jnp.dot(h, whh, preferred_element_type=jnp.float32)
        i_g = jax.nn.sigmoid(gates[:, 0 * H2:1 * H2])
        f_g = jax.nn.sigmoid(gates[:, 1 * H2:2 * H2])
        g_g = jnp.tanh(gates[:, 2 * H2:3 * H2])
        o_g = jax.nn.sigmoid(gates[:, 3 * H2:4 * H2])
        c = f_g * c + i_g * g_g
        h = o_g * jnp.tanh(c)
        return h, c, s + h

    z = jnp.zeros((B, H2), jnp.float32)
    # T is a compile-time constant and small -> fully unroll for LLO scheduling.
    _, _, s = lax.fori_loop(0, T, step, (z, z, z), unroll=True)

    out_ref[...] = s


def state_extractor_forward(x_tokens, params):
    """x_tokens: int32 (B, T). Returns float32 (B, 2*H) == (B, state_dim)."""
    emb_table = params["embedding"]            # (max_words, D)
    emb = emb_table[x_tokens]                  # (B, T, D)  -- glue gather
    emb = emb.astype(jnp.float32)

    B, T, D = emb.shape
    H = params["whh_f"].shape[-1]
    H2, H4, H8 = 2 * H, 4 * H, 8 * H

    # ---- one-time weight re-layout (XLA side, tiny) -------------------------------
    # Per-direction input weights (4, D, H) -> (D, 4H) with gate-major columns.
    w_in_f = jnp.transpose(params["wih_f"], (1, 0, 2)).reshape(D, H4)
    w_in_r = jnp.transpose(params["wih_r"], (1, 0, 2)).reshape(D, H4)
    b_f = params["b_f"].reshape(H4)            # bias already = b_ih + b_hh
    b_r = params["b_r"].reshape(H4)

    # Hoisted input projection + bias fold, time-major, no materialized transpose of emb.
    xw_f = jnp.einsum('btd,dg->tbg', emb, w_in_f) + b_f          # (T, B, 4H)
    xw_r = jnp.einsum('btd,dg->tbg', emb, w_in_r) + b_r          # (T, B, 4H)
    xw_r = xw_r[::-1]                                            # pre-reverse time for bwd dir
    # Interleave per gate: columns become [gate][dir][h]  -> (T, B, 8H)
    xw = jnp.stack([xw_f.reshape(T, B, 4, H),
                    xw_r.reshape(T, B, 4, H)], axis=3).reshape(T, B, H8)

    # Block-diagonal hidden->hidden matrix (2H, 8H), same [gate][dir][h] column layout.
    def dir_rows(whh, d):
        blocks = jnp.zeros((4, 2, H, H), jnp.float32).at[:, d].set(whh)   # (4, 2, H, H)
        return jnp.transpose(blocks, (2, 0, 1, 3)).reshape(H, H8)         # (H, 8H)

    whh_blk = jnp.concatenate(
        [dir_rows(params["whh_f"], 0), dir_rows(params["whh_r"], 1)], axis=0)  # (2H, 8H)

    cost = pl.CostEstimate(
        flops=2 * T * B * H2 * H8 + 10 * T * B * H2,
        transcendentals=5 * T * B * H2,
        bytes_accessed=(T * B * H8 + H2 * H8 + B * H2) * 4,
    )

    out = pl.pallas_call(
        _bilstm_sum_kernel,
        out_shape=jax.ShapeDtypeStruct((B, H2), jnp.float32),
        grid=(1,),
        in_specs=[
            pl.BlockSpec((T, B, H8), lambda i: (0, 0, 0)),
            pl.BlockSpec((H2, H8), lambda i: (0, 0)),
        ],
        out_specs=pl.BlockSpec((B, H2), lambda i: (0, 0)),
        compiler_params=pltpu.CompilerParams(
            dimension_semantics=("arbitrary",)),
        cost_estimate=cost,
    )(xw.astype(jnp.float32), whh_blk)

    # out is already [sum_t h_fwd | sum_t h_bwd] == torch.sum(lstm_out, dim=1)
    return out


def state_extractor_reference(x_tokens, params):
    """Pure-JAX reference with identical math (for verification)."""
    emb = params["embedding"][x_tokens]        # (B, T, D)
    B, T, D = emb.shape
    H = params["whh_f"].shape[-1]

    def run_dir(seq, wih, whh, b):
        h = jnp.zeros((B, H), jnp.float32)
        c = jnp.zeros((B, H), jnp.float32)
        s = jnp.zeros((B, H), jnp.float32)
        for t in range(T):
            x = seq[:, t, :]
            gates = [x @ wih[g] + h @ whh[g] + b[g][None, :] for g in range(4)]
            i_g = jax.nn.sigmoid(gates[0])
            f_g = jax.nn.sigmoid(gates[1])
            g_g = jnp.tanh(gates[2])
            o_g = jax.nn.sigmoid(gates[3])
            c = f_g * c + i_g * g_g
            h = o_g * jnp.tanh(c)
            s = s + h
        return s

    s_f = run_dir(emb, params["wih_f"], params["whh_f"], params["b_f"])
    s_b = run_dir(emb[:, ::-1, :], params["wih_r"], params["whh_r"], params["b_r"])
    return jnp.concatenate([s_f, s_b], axis=-1)


def make_params(key, max_words, state_dim):
    H = state_dim // 2
    D = state_dim
    bound = 1.0 / math.sqrt(H)
    ks = jax.random.split(key, 11)
    u = lambda k, shape: jax.random.uniform(k, shape, jnp.float32, -bound, bound)
    return {
        "embedding": jax.random.normal(ks[0], (max_words, D), jnp.float32),
        # gate order (i, f, g, o) as in PyTorch nn.LSTM; bias = b_ih + b_hh
        "wih_f": u(ks[1], (4, D, H)),
        "whh_f": u(ks[2], (4, H, H)),
        "b_f": u(ks[3], (4, H)) + u(ks[4], (4, H)),
        "wih_r": u(ks[5], (4, D, H)),
        "whh_r": u(ks[6], (4, H, H)),
        "b_r": u(ks[7], (4, H)) + u(ks[8], (4, H)),
    }


if __name__ == "__main__":
    MAX_WORDS = 100
    STATE_DIM = 32      # -> hidden size per direction H = 16, 8H = 128 lanes
    B, T = 2, 8

    key = jax.random.PRNGKey(0)
    k_params, k_tokens = jax.random.split(key)

    params = make_params(k_params, MAX_WORDS, STATE_DIM)
    x_tokens = jax.random.randint(k_tokens, (B, T), 0, MAX_WORDS, dtype=jnp.int32)

    out = jax.jit(state_extractor_forward)(x_tokens, params)
    out = jax.block_until_ready(out)

    ref = state_extractor_reference(x_tokens, params)
    assert out.shape == (B, STATE_DIM), out.shape
    np.testing.assert_allclose(np.asarray(out), np.asarray(ref), rtol=1e-3, atol=1e-3)

    print("KERNEL_OK")
</pallas_src>

<mosaic_0001>
module attributes {stable_mosaic.version = 11 : i64} {
  func.func @_bilstm_sum_kernel(%arg0: i32, %arg1: memref<8x2x128xf32, #tpu.memory_space<vmem>>, %arg2: memref<32x128xf32, #tpu.memory_space<vmem>>, %arg3: memref<2x32xf32, #tpu.memory_space<vmem>>) attributes {dimension_semantics = [#tpu.dimension_semantics<arbitrary>], iteration_bounds = array<i64: 1>, scalar_prefetch = 0 : i64, scratch_operands = 0 : i64, tpu.core_type = #tpu.core_type<tc>, window_params = [{pipeline_mode = #tpu.pipeline_mode<synchronous>, transform_indices = @transform_0, window_bounds = array<i64: 8, 2, 128>}, {pipeline_mode = #tpu.pipeline_mode<synchronous>, transform_indices = @transform_1, window_bounds = array<i64: 32, 128>}, {pipeline_mode = #tpu.pipeline_mode<synchronous>, transform_indices = @transform_2, window_bounds = array<i64: 2, 32>}]} {
    %c0 = arith.constant 0 : index
    %c0_0 = arith.constant 0 : index
    %0 = vector.load %arg2[%c0, %c0_0] : memref<32x128xf32, #tpu.memory_space<vmem>>, vector<32x128xf32>
    %cst = arith.constant 0.000000e+00 : f32
    %1 = vector.broadcast %cst : f32 to vector<2x32xf32>
    %c0_i32 = arith.constant 0 : i32
    %2 = arith.index_cast %c0_i32 : i32 to index
    %c0_1 = arith.constant 0 : index
    %c0_2 = arith.constant 0 : index
    %3 = vector.load %arg1[%2, %c0_1, %c0_2] : memref<8x2x128xf32, #tpu.memory_space<vmem>>, vector<1x2x128xf32>
    %4 = vector.shape_cast %3 : vector<1x2x128xf32> to vector<2x128xf32>
    %cst_3 = arith.constant dense<0.000000e+00> : vector<2x128xf32>
    %5 = tpu.matmul %1, %0, %cst_3 {dimension_numbers = #tpu.dot_dimension_numbers<[1], [0], [0], [1], [0, 0, 1, 1], [], []>} : vector<2x32xf32>, vector<32x128xf32>, vector<2x128xf32> -> vector<2x128xf32>
    %6 = arith.addf %4, %5 : vector<2x128xf32>
    %7 = vector.extract_strided_slice %6 {offsets = [0, 0], sizes = [2, 32], strides = [1, 1]} : vector<2x128xf32> to vector<2x32xf32>
    %8 = arith.negf %7 : vector<2x32xf32>
    %9 = math.exp %8 : vector<2x32xf32>
    %cst_4 = arith.constant 1.000000e+00 : f32
    %10 = vector.broadcast %cst_4 : f32 to vector<2x32xf32>
    %11 = arith.addf %10, %9 : vector<2x32xf32>
    %12 = arith.divf %10, %11 : vector<2x32xf32>
    %13 = vector.extract_strided_slice %6 {offsets = [0, 32], sizes = [2, 32], strides = [1, 1]} : vector<2x128xf32> to vector<2x32xf32>
    %14 = arith.negf %13 : vector<2x32xf32>
    %15 = math.exp %14 : vector<2x32xf32>
    %cst_5 = arith.constant 1.000000e+00 : f32
    %16 = vector.broadcast %cst_5 : f32 to vector<2x32xf32>
    %17 = arith.addf %16, %15 : vector<2x32xf32>
    %18 = arith.divf %16, %17 : vector<2x32xf32>
    %19 = vector.extract_strided_slice %6 {offsets = [0, 64], sizes = [2, 32], strides = [1, 1]} : vector<2x128xf32> to vector<2x32xf32>
    %20 = math.tanh %19 : vector<2x32xf32>
    %21 = vector.extract_strided_slice %6 {offsets = [0, 96], sizes = [2, 32], strides = [1, 1]} : vector<2x128xf32> to vector<2x32xf32>
    %22 = arith.negf %21 : vector<2x32xf32>
    %23 = math.exp %22 : vector<2x32xf32>
    %cst_6 = arith.constant 1.000000e+00 : f32
    %24 = vector.broadcast %cst_6 : f32 to vector<2x32xf32>
    %25 = arith.addf %24, %23 : vector<2x32xf32>
    %26 = arith.divf %24, %25 : vector<2x32xf32>
    %27 = arith.mulf %18, %1 : vector<2x32xf32>
    %28 = arith.mulf %12, %20 : vector<2x32xf32>
    %29 = arith.addf %27, %28 : vector<2x32xf32>
    %30 = math.tanh %29 : vector<2x32xf32>
    %31 = arith.mulf %26, %30 : vector<2x32xf32>
    %32 = arith.addf %1, %31 : vector<2x32xf32>
    %c1_i32 = arith.constant 1 : i32
    %33 = arith.index_cast %c1_i32 : i32 to index
    %c0_7 = arith.constant 0 : index
    %c0_8 = arith.constant 0 : index
    %34 = vector.load %arg1[%33, %c0_7, %c0_8] : memref<8x2x128xf32, #tpu.memory_space<vmem>>, vector<1x2x128xf32>
    %35 = vector.shape_cast %34 : vector<1x2x128xf32> to vector<2x128xf32>
    %cst_9 = arith.constant dense<0.000000e+00> : vector<2x128xf32>
    %36 = tpu.matmul %31, %0, %cst_9 {dimension_numbers = #tpu.dot_dimension_numbers<[1], [0], [0], [1], [0, 0, 1, 1], [], []>} : vector<2x32xf32>, vector<32x128xf32>, vector<2x128xf32> -> vector<2x128xf32>
    %37 = arith.addf %35, %36 : vector<2x128xf32>
    %38 = vector.extract_strided_slice %37 {offsets = [0, 0], sizes = [2, 32], strides = [1, 1]} : vector<2x128xf32> to vector<2x32xf32>
    %39 = arith.negf %38 : vector<2x32xf32>
    %40 = math.exp %39 : vector<2x32xf32>
    %cst_10 = arith.constant 1.000000e+00 : f32
    %41 = vector.broadcast %cst_10 : f32 to vector<2x32xf32>
    %42 = arith.addf %41, %40 : vector<2x32xf32>
    %43 = arith.divf %41, %42 : vector<2x32xf32>
    %44 = vector.extract_strided_slice %37 {offsets = [0, 32], sizes = [2, 32], strides = [1, 1]} : vector<2x128xf32> to vector<2x32xf32>
    %45 = arith.negf %44 : vector<2x32xf32>
    %46 = math.exp %45 : vector<2x32xf32>
    %cst_11 = arith.constant 1.000000e+00 : f32
    %47 = vector.broadcast %cst_11 : f32 to vector<2x32xf32>
    %48 = arith.addf %47, %46 : vector<2x32xf32>
    %49 = arith.divf %47, %48 : vector<2x32xf32>
    %50 = vector.extract_strided_slice %37 {offsets = [0, 64], sizes = [2, 32], strides = [1, 1]} : vector<2x128xf32> to vector<2x32xf32>
    %51 = math.tanh %50 : vector<2x32xf32>
    %52 = vector.extract_strided_slice %37 {offsets = [0, 96], sizes = [2, 32], strides = [1, 1]} : vector<2x128xf32> to vector<2x32xf32>
    %53 = arith.negf %52 : vector<2x32xf32>
    %54 = math.exp %53 : vector<2x32xf32>
    %cst_12 = arith.constant 1.000000e+00 : f32
    %55 = vector.broadcast %cst_12 : f32 to vector<2x32xf32>
    %56 = arith.addf %55, %54 : vector<2x32xf32>
    %57 = arith.divf %55, %56 : vector<2x32xf32>
    %58 = arith.mulf %49, %29 : vector<2x32xf32>
    %59 = arith.mulf %43, %51 : vector<2x32xf32>
    %60 = arith.addf %58, %59 : vector<2x32xf32>
    %61 = math.tanh %60 : vector<2x32xf32>
    %62 = arith.mulf %57, %61 : vector<2x32xf32>
    %63 = arith.addf %32, %62 : vector<2x32xf32>
    %c2_i32 = arith.constant 2 : i32
    %64 = arith.index_cast %c2_i32 : i32 to index
    %c0_13 = arith.constant 0 : index
    %c0_14 = arith.constant 0 : index
    %65 = vector.load %arg1[%64, %c0_13, %c0_14] : memref<8x2x128xf32, #tpu.memory_space<vmem>>, vector<1x2x128xf32>
    %66 = vector.shape_cast %65 : vector<1x2x128xf32> to vector<2x128xf32>
    %cst_15 = arith.constant dense<0.000000e+00> : vector<2x128xf32>
    %67 = tpu.matmul %62, %0, %cst_15 {dimension_numbers = #tpu.dot_dimension_numbers<[1], [0], [0], [1], [0, 0, 1, 1], [], []>} : vector<2x32xf32>, vector<32x128xf32>, vector<2x128xf32> -> vector<2x128xf32>
    %68 = arith.addf %66, %67 : vector<2x128xf32>
    %69 = vector.extract_strided_slice %68 {offsets = [0, 0], sizes = [2, 32], strides = [1, 1]} : vector<2x128xf32> to vector<2x32xf32>
    %70 = arith.negf %69 : vector<2x32xf32>
    %71 = math.exp %70 : vector<2x32xf32>
    %cst_16 = arith.constant 1.000000e+00 : f32
    %72 = vector.broadcast %cst_16 : f32 to vector<2x32xf32>
    %73 = arith.addf %72, %71 : vector<2x32xf32>
    %74 = arith.divf %72, %73 : vector<2x32xf32>
    %75 = vector.extract_strided_slice %68 {offsets = [0, 32], sizes = [2, 32], strides = [1, 1]} : vector<2x128xf32> to vector<2x32xf32>
    %76 = arith.negf %75 : vector<2x32xf32>
    %77 = math.exp %76 : vector<2x32xf32>
    %cst_17 = arith.constant 1.000000e+00 : f32
    %78 = vector.broadcast %cst_17 : f32 to vector<2x32xf32>
    %79 = arith.addf %78, %77 : vector<2x32xf32>
    %80 = arith.divf %78, %79 : vector<2x32xf32>
    %81 = vector.extract_strided_slice %68 {offsets = [0, 64], sizes = [2, 32], strides = [1, 1]} : vector<2x128xf32> to vector<2x32xf32>
    %82 = math.tanh %81 : vector<2x32xf32>
    %83 = vector.extract_strided_slice %68 {offsets = [0, 96], sizes = [2, 32], strides = [1, 1]} : vector<2x128xf32> to vector<2x32xf32>
    %84 = arith.negf %83 : vector<2x32xf32>
    %85 = math.exp %84 : vector<2x32xf32>
    %cst_18 = arith.constant 1.000000e+00 : f32
    %86 = vector.broadcast %cst_18 : f32 to vector<2x32xf32>
    %87 = arith.addf %86, %85 : vector<2x32xf32>
    %88 = arith.divf %86, %87 : vector<2x32xf32>
    %89 = arith.mulf %80, %60 : vector<2x32xf32>
    %90 = arith.mulf %74, %82 : vector<2x32xf32>
    %91 = arith.addf %89, %90 : vector<2x32xf32>
    %92 = math.tanh %91 : vector<2x32xf32>
    %93 = arith.mulf %88, %92 : vector<2x32xf32>
    %94 = arith.addf %63, %93 : vector<2x32xf32>
    %c3_i32 = arith.constant 3 : i32
    %95 = arith.index_cast %c3_i32 : i32 to index
    %c0_19 = arith.constant 0 : index
    %c0_20 = arith.constant 0 : index
    %96 = vector.load %arg1[%95, %c0_19, %c0_20] : memref<8x2x128xf32, #tpu.memory_space<vmem>>, vector<1x2x128xf32>
    %97 = vector.shape_cast %96 : vector<1x2x128xf32> to vector<2x128xf32>
    %cst_21 = arith.constant dense<0.000000e+00> : vector<2x128xf32>
    %98 = tpu.matmul %93, %0, %cst_21 {dimension_numbers = #tpu.dot_dimension_numbers<[1], [0], [0], [1], [0, 0, 1, 1], [], []>} : vector<2x32xf32>, vector<32x128xf32>, vector<2x128xf32> -> vector<2x128xf32>
    %99 = arith.addf %97, %98 : vector<2x128xf32>
    %100 = vector.extract_strided_slice %99 {offsets = [0, 0], sizes = [2, 32], strides = [1, 1]} : vector<2x128xf32> to vector<2x32xf32>
    %101 = arith.negf %100 : vector<2x32xf32>
    %102 = math.exp %101 : vector<2x32xf32>
    %cst_22 = arith.constant 1.000000e+00 : f32
    %103 = vector.broadcast %cst_22 : f32 to vector<2x32xf32>
    %104 = arith.addf %103, %102 : vector<2x32xf32>
    %105 = arith.divf %103, %104 : vector<2x32xf32>
    %106 = vector.extract_strided_slice %99 {offsets = [0, 32], sizes = [2, 32], strides = [1, 1]} : vector<2x128xf32> to vector<2x32xf32>
    %107 = arith.negf %106 : vector<2x32xf32>
    %108 = math.exp %107 : vector<2x32xf32>
    %cst_23 = arith.constant 1.000000e+00 : f32
    %109 = vector.broadcast %cst_23 : f32 to vector<2x32xf32>
    %110 = arith.addf %109, %108 : vector<2x32xf32>
    %111 = arith.divf %109, %110 : vector<2x32xf32>
    %112 = vector.extract_strided_slice %99 {offsets = [0, 64], sizes = [2, 32], strides = [1, 1]} : vector<2x128xf32> to vector<2x32xf32>
    %113 = math.tanh %112 : vector<2x32xf32>
    %114 = vector.extract_strided_slice %99 {offsets = [0, 96], sizes = [2, 32], strides = [1, 1]} : vector<2x128xf32> to vector<2x32xf32>
    %115 = arith.negf %114 : vector<2x32xf32>
    %116 = math.exp %115 : vector<2x32xf32>
    %cst_24 = arith.constant 1.000000e+00 : f32
    %117 = vector.broadcast %cst_24 : f32 to vector<2x32xf32>
    %118 = arith.addf %117, %116 : vector<2x32xf32>
    %119 = arith.divf %117, %118 : vector<2x32xf32>
    %120 = arith.mulf %111, %91 : vector<2x32xf32>
    %121 = arith.mulf %105, %113 : vector<2x32xf32>
    %122 = arith.addf %120, %121 : vector<2x32xf32>
    %123 = math.tanh %122 : vector<2x32xf32>
    %124 = arith.mulf %119, %123 : vector<2x32xf32>
    %125 = arith.addf %94, %124 : vector<2x32xf32>
    %c4_i32 = arith.constant 4 : i32
    %126 = arith.index_cast %c4_i32 : i32 to index
    %c0_25 = arith.constant 0 : index
    %c0_26 = arith.constant 0 : index
    %127 = vector.load %arg1[%126, %c0_25, %c0_26] : memref<8x2x128xf32, #tpu.memory_space<vmem>>, vector<1x2x128xf32>
    %128 = vector.shape_cast %127 : vector<1x2x128xf32> to vector<2x128xf32>
    %cst_27 = arith.constant dense<0.000000e+00> : vector<2x128xf32>
    %129 = tpu.matmul %124, %0, %cst_27 {dimension_numbers = #tpu.dot_dimension_numbers<[1], [0], [0], [1], [0, 0, 1, 1], [], []>} : vector<2x32xf32>, vector<32x128xf32>, vector<2x128xf32> -> vector<2x128xf32>
    %130 = arith.addf %128, %129 : vector<2x128xf32>
    %131 = vector.extract_strided_slice %130 {offsets = [0, 0], sizes = [2, 32], strides = [1, 1]} : vector<2x128xf32> to vector<2x32xf32>
    %132 = arith.negf %131 : vector<2x32xf32>
    %133 = math.exp %132 : vector<2x32xf32>
    %cst_28 = arith.constant 1.000000e+00 : f32
    %134 = vector.broadcast %cst_28 : f32 to vector<2x32xf32>
    %135 = arith.addf %134, %133 : vector<2x32xf32>
    %136 = arith.divf %134, %135 : vector<2x32xf32>
    %137 = vector.extract_strided_slice %130 {offsets = [0, 32], sizes = [2, 32], strides = [1, 1]} : vector<2x128xf32> to vector<2x32xf32>
    %138 = arith.negf %137 : vector<2x32xf32>
    %139 = math.exp %138 : vector<2x32xf32>
    %cst_29 = arith.constant 1.000000e+00 : f32
    %140 = vector.broadcast %cst_29 : f32 to vector<2x32xf32>
    %141 = arith.addf %140, %139 : vector<2x32xf32>
    %142 = arith.divf %140, %141 : vector<2x32xf32>
    %143 = vector.extract_strided_slice %130 {offsets = [0, 64], sizes = [2, 32], strides = [1, 1]} : vector<2x128xf32> to vector<2x32xf32>
    %144 = math.tanh %143 : vector<2x32xf32>
    %145 = vector.extract_strided_slice %130 {offsets = [0, 96], sizes = [2, 32], strides = [1, 1]} : vector<2x128xf32> to vector<2x32xf32>
    %146 = arith.negf %145 : vector<2x32xf32>
    %147 = math.exp %146 : vector<2x32xf32>
    %cst_30 = arith.constant 1.000000e+00 : f32
    %148 = vector.broadcast %cst_30 : f32 to vector<2x32xf32>
    %149 = arith.addf %148, %147 : vector<2x32xf32>
    %150 = arith.divf %148, %149 : vector<2x32xf32>
    %151 = arith.mulf %142, %122 : vector<2x32xf32>
    %152 = arith.mulf %136, %144 : vector<2x32xf32>
    %153 = arith.addf %151, %152 : vector<2x32xf32>
    %154 = math.tanh %153 : vector<2x32xf32>
    %155 = arith.mulf %150, %154 : vector<2x32xf32>
    %156 = arith.addf %125, %155 : vector<2x32xf32>
    %c5_i32 = arith.constant 5 : i32
    %157 = arith.index_cast %c5_i32 : i32 to index
    %c0_31 = arith.constant 0 : index
    %c0_32 = arith.constant 0 : index
    %158 = vector.load %arg1[%157, %c0_31, %c0_32] : memref<8x2x128xf32, #tpu.memory_space<vmem>>, vector<1x2x128xf32>
    %159 = vector.shape_cast %158 : vector<1x2x128xf32> to vector<2x128xf32>
    %cst_33 = arith.constant dense<0.000000e+00> : vector<2x128xf32>
    %160 = tpu.matmul %155, %0, %cst_33 {dimension_numbers = #tpu.dot_dimension_numbers<[1], [0], [0], [1], [0, 0, 1, 1], [], []>} : vector<2x32xf32>, vector<32x128xf32>, vector<2x128xf32> -> vector<2x128xf32>
    %161 = arith.addf %159, %160 : vector<2x128xf32>
    %162 = vector.extract_strided_slice %161 {offsets = [0, 0], sizes = [2, 32], strides = [1, 1]} : vector<2x128xf32> to vector<2x32xf32>
    %163 = arith.negf %162 : vector<2x32xf32>
    %164 = math.exp %163 : vector<2x32xf32>
    %cst_34 = arith.constant 1.000000e+00 : f32
    %165 = vector.broadcast %cst_34 : f32 to vector<2x32xf32>
    %166 = arith.addf %165, %164 : vector<2x32xf32>
    %167 = arith.divf %165, %166 : vector<2x32xf32>
    %168 = vector.extract_strided_slice %161 {offsets = [0, 32], sizes = [2, 32], strides = [1, 1]} : vector<2x128xf32> to vector<2x32xf32>
    %169 = arith.negf %168 : vector<2x32xf32>
    %170 = math.exp %169 : vector<2x32xf32>
    %cst_35 = arith.constant 1.000000e+00 : f32
    %171 = vector.broadcast %cst_35 : f32 to vector<2x32xf32>
    %172 = arith.addf %171, %170 : vector<2x32xf32>
    %173 = arith.divf %171, %172 : vector<2x32xf32>
    %174 = vector.extract_strided_slice %161 {offsets = [0, 64], sizes = [2, 32], strides = [1, 1]} : vector<2x128xf32> to vector<2x32xf32>
    %175 = math.tanh %174 : vector<2x32xf32>
    %176 = vector.extract_strided_slice %161 {offsets = [0, 96], sizes = [2, 32], strides = [1, 1]} : vector<2x128xf32> to vector<2x32xf32>
    %177 = arith.negf %176 : vector<2x32xf32>
    %178 = math.exp %177 : vector<2x32xf32>
    %cst_36 = arith.constant 1.000000e+00 : f32
    %179 = vector.broadcast %cst_36 : f32 to vector<2x32xf32>
    %180 = arith.addf %179, %178 : vector<2x32xf32>
    %181 = arith.divf %179, %180 : vector<2x32xf32>
    %182 = arith.mulf %173, %153 : vector<2x32xf32>
    %183 = arith.mulf %167, %175 : vector<2x32xf32>
    %184 = arith.addf %182, %183 : vector<2x32xf32>
    %185 = math.tanh %184 : vector<2x32xf32>
    %186 = arith.mulf %181, %185 : vector<2x32xf32>
    %187 = arith.addf %156, %186 : vector<2x32xf32>
    %c6_i32 = arith.constant 6 : i32
    %188 = arith.index_cast %c6_i32 : i32 to index
    %c0_37 = arith.constant 0 : index
    %c0_38 = arith.constant 0 : index
    %189 = vector.load %arg1[%188, %c0_37, %c0_38] : memref<8x2x128xf32, #tpu.memory_space<vmem>>, vector<1x2x128xf32>
    %190 = vector.shape_cast %189 : vector<1x2x128xf32> to vector<2x128xf32>
    %cst_39 = arith.constant dense<0.000000e+00> : vector<2x128xf32>
    %191 = tpu.matmul %186, %0, %cst_39 {dimension_numbers = #tpu.dot_dimension_numbers<[1], [0], [0], [1], [0, 0, 1, 1], [], []>} : vector<2x32xf32>, vector<32x128xf32>, vector<2x128xf32> -> vector<2x128xf32>
    %192 = arith.addf %190, %191 : vector<2x128xf32>
    %193 = vector.extract_strided_slice %192 {offsets = [0, 0], sizes = [2, 32], strides = [1, 1]} : vector<2x128xf32> to vector<2x32xf32>
    %194 = arith.negf %193 : vector<2x32xf32>
    %195 = math.exp %194 : vector<2x32xf32>
    %cst_40 = arith.constant 1.000000e+00 : f32
    %196 = vector.broadcast %cst_40 : f32 to vector<2x32xf32>
    %197 = arith.addf %196, %195 : vector<2x32xf32>
    %198 = arith.divf %196, %197 : vector<2x32xf32>
    %199 = vector.extract_strided_slice %192 {offsets = [0, 32], sizes = [2, 32], strides = [1, 1]} : vector<2x128xf32> to vector<2x32xf32>
    %200 = arith.negf %199 : vector<2x32xf32>
    %201 = math.exp %200 : vector<2x32xf32>
    %cst_41 = arith.constant 1.000000e+00 : f32
    %202 = vector.broadcast %cst_41 : f32 to vector<2x32xf32>
    %203 = arith.addf %202, %201 : vector<2x32xf32>
    %204 = arith.divf %202, %203 : vector<2x32xf32>
    %205 = vector.extract_strided_slice %192 {offsets = [0, 64], sizes = [2, 32], strides = [1, 1]} : vector<2x128xf32> to vector<2x32xf32>
    %206 = math.tanh %205 : vector<2x32xf32>
    %207 = vector.extract_strided_slice %192 {offsets = [0, 96], sizes = [2, 32], strides = [1, 1]} : vector<2x128xf32> to vector<2x32xf32>
    %208 = arith.negf %207 : vector<2x32xf32>
    %209 = math.exp %208 : vector<2x32xf32>
    %cst_42 = arith.constant 1.000000e+00 : f32
    %210 = vector.broadcast %cst_42 : f32 to vector<2x32xf32>
    %211 = arith.addf %210, %209 : vector<2x32xf32>
    %212 = arith.divf %210, %211 : vector<2x32xf32>
    %213 = arith.mulf %204, %184 : vector<2x32xf32>
    %214 = arith.mulf %198, %206 : vector<2x32xf32>
    %215 = arith.addf %213, %214 : vector<2x32xf32>
    %216 = math.tanh %215 : vector<2x32xf32>
    %217 = arith.mulf %212, %216 : vector<2x32xf32>
    %218 = arith.addf %187, %217 : vector<2x32xf32>
    %c7_i32 = arith.constant 7 : i32
    %219 = arith.index_cast %c7_i32 : i32 to index
    %c0_43 = arith.constant 0 : index
    %c0_44 = arith.constant 0 : index
    %220 = vector.load %arg1[%219, %c0_43, %c0_44] : memref<8x2x128xf32, #tpu.memory_space<vmem>>, vector<1x2x128xf32>
    %221 = vector.shape_cast %220 : vector<1x2x128xf32> to vector<2x128xf32>
    %cst_45 = arith.constant dense<0.000000e+00> : vector<2x128xf32>
    %222 = tpu.matmul %217, %0, %cst_45 {dimension_numbers = #tpu.dot_dimension_numbers<[1], [0], [0], [1], [0, 0, 1, 1], [], []>} : vector<2x32xf32>, vector<32x128xf32>, vector<2x128xf32> -> vector<2x128xf32>
    %223 = arith.addf %221, %222 : vector<2x128xf32>
    %224 = vector.extract_strided_slice %223 {offsets = [0, 0], sizes = [2, 32], strides = [1, 1]} : vector<2x128xf32> to vector<2x32xf32>
    %225 = arith.negf %224 : vector<2x32xf32>
    %226 = math.exp %225 : vector<2x32xf32>
    %cst_46 = arith.constant 1.000000e+00 : f32
    %227 = vector.broadcast %cst_46 : f32 to vector<2x32xf32>
    %228 = arith.addf %227, %226 : vector<2x32xf32>
    %229 = arith.divf %227, %228 : vector<2x32xf32>
    %230 = vector.extract_strided_slice %223 {offsets = [0, 32], sizes = [2, 32], strides = [1, 1]} : vector<2x128xf32> to vector<2x32xf32>
    %231 = arith.negf %230 : vector<2x32xf32>
    %232 = math.exp %231 : vector<2x32xf32>
    %cst_47 = arith.constant 1.000000e+00 : f32
    %233 = vector.broadcast %cst_47 : f32 to vector<2x32xf32>
    %234 = arith.addf %233, %232 : vector<2x32xf32>
    %235 = arith.divf %233, %234 : vector<2x32xf32>
    %236 = vector.extract_strided_slice %223 {offsets = [0, 64], sizes = [2, 32], strides = [1, 1]} : vector<2x128xf32> to vector<2x32xf32>
    %237 = math.tanh %236 : vector<2x32xf32>
    %238 = vector.extract_strided_slice %223 {offsets = [0, 96], sizes = [2, 32], strides = [1, 1]} : vector<2x128xf32> to vector<2x32xf32>
    %239 = arith.negf %238 : vector<2x32xf32>
    %240 = math.exp %239 : vector<2x32xf32>
    %cst_48 = arith.constant 1.000000e+00 : f32
    %241 = vector.broadcast %cst_48 : f32 to vector<2x32xf32>
    %242 = arith.addf %241, %240 : vector<2x32xf32>
    %243 = arith.divf %241, %242 : vector<2x32xf32>
    %244 = arith.mulf %235, %215 : vector<2x32xf32>
    %245 = arith.mulf %229, %237 : vector<2x32xf32>
    %246 = arith.addf %244, %245 : vector<2x32xf32>
    %247 = math.tanh %246 : vector<2x32xf32>
    %248 = arith.mulf %243, %247 : vector<2x32xf32>
    %249 = arith.addf %218, %248 : vector<2x32xf32>
    %c8_i32 = arith.constant 8 : i32
    %c0_49 = arith.constant 0 : index
    %c0_50 = arith.constant 0 : index
    %250 = vector.load %arg3[%c0_49, %c0_50] : memref<2x32xf32, #tpu.memory_space<vmem>>, vector<2x32xf32>
    tpu.vector_store %arg3[%c0_49, %c0_50], %249 {strides = array<i32>} : memref<2x32xf32, #tpu.memory_space<vmem>>, vector<2x32xf32>,
    return
  }
  func.func @transform_0(%arg0: i32) -> (i32, i32, i32) {
    %c0_i32 = arith.constant 0 : i32
    %c0_i32_0 = arith.constant 0 : i32
    %c0_i32_1 = arith.constant 0 : i32
    %c0_i32_2 = arith.constant 0 : i32
    return %c0_i32, %c0_i32_0, %c0_i32_1 : i32, i32, i32
  }
  func.func @transform_1(%arg0: i32) -> (i32, i32) {
    %c0_i32 = arith.constant 0 : i32
    %c0_i32_0 = arith.constant 0 : i32
    %c0_i32_1 = arith.constant 0 : i32
    return %c0_i32, %c0_i32_0 : i32, i32
  }
  func.func @transform_2(%arg0: i32) -> (i32, i32) {
    %c0_i32 = arith.constant 0 : i32
    %c0_i32_0 = arith.constant 0 : i32
    %c0_i32_1 = arith.constant 0 : i32
    return %c0_i32, %c0_i32_0 : i32, i32
  }
}

</mosaic_0001>

<bundles_post_ra>
// kernel: state_extractor_forward.1
= control target key start
LH: loop header
LB: loop body
LE: loop exit
PB: predicated region body
PF: predicated region fallthrough
CT: control target
= control target key end

     0   :  { %s781_s0 = inlined_call_operand.vmem [shape: f32[8,2,128], index: 0, kind: input, shape index: {}]   ;;  %s782_s1 = inlined_call_operand.vmem [shape: f32[32,128], index: 1, kind: input, shape index: {}]   ;;  %s783_s2 = inlined_call_operand.hbm [shape: f32[2,32], index: 2, kind: output, shape index: {}]  }
   0x1   :  { %v15_v0 = vld [vmem:[%s782_s1 + $0x18] sm:$0xff]  ;;  %v14_v1 = vld [vmem:[%s782_s1 + $0x10] sm:$0xff] }
   0x2   :  { %33 = vmatpush.msra.mxu0 %v15_v0  ;;  %99 = vmatpush.msra.mxu1 %v15_v0 }
   0x3   :  { %7 = vsyncpa [#allocation3], 0  ;;  %v13_v2 = vld [vmem:[%s782_s1 + $0x8] sm:$0xff]  ;;  %165 = vmatpush.msra.mxu2 %v15_v0  ;;  %231 = vmatpush.msra.mxu3 %v15_v0  ;;  %v12_v3 = vld [vmem:[%s782_s1] sm:$0xff]  ;;  %v680_v4 = vmov 0.0   ;;  %s681_s18 = smov 64  }
   0x4   :  { %34 = vmatpush.msra.mxu0 %v14_v1  ;;  %100 = vmatpush.msra.mxu1 %v14_v1  ;;  %v16_v5 = vld [vmem:[%s781_s0] sm:$0x3]  ;;  %s682_s19 = smov 32   ;;  %vm17_vm4 = vcmask 261120   ;;  %v565_v31 = vld [vmem:[%s781_s0 + $0x2] sm:$0x3] }
   0x5   :  { %166 = vmatpush.msra.mxu2 %v14_v1  ;;  %232 = vmatpush.msra.mxu3 %v14_v1  ;;  %v568_v57 = vld [vmem:[%s781_s0 + $0x4] sm:$0x3]  ;;  %s555_s9 = sshll.u32 %s783_s2, 4  ;;  %s556_s9 = int_to_ptr.hbm [resolvable:$true] %s555_s9 }
   0x6   :  { %35 = vmatpush.msra.mxu0 %v13_v2  ;;  %101 = vmatpush.msra.mxu1 %v13_v2 }
   0x7   :  { %167 = vmatpush.msra.mxu2 %v13_v2  ;;  %233 = vmatpush.msra.mxu3 %v13_v2 }
   0x8   :  { %36 = vmatpush.msra.mxu0 %v12_v3  ;;  %102 = vmatpush.msra.mxu1 %v12_v3 }
   0x9   :  { %37 = vmatmul.f32.vlgmr.msra.gmra.mxu0 %v680_v4  ;;  %168 = vmatpush.msra.mxu2 %v12_v3 }
   0xa   :  { %234 = vmatpush.msra.mxu3 %v12_v3  ;;  %297 = vmatpush.msrb.mxu0 %v15_v0 }
   0xb   :  { %363 = vmatpush.msrb.mxu1 %v15_v0  ;;  %429 = vmatpush.msrb.mxu2 %v15_v0 }
   0xc   :  { %298 = vmatpush.msrb.mxu0 %v14_v1  ;;  %495 = vmatpush.msrb.mxu3 %v15_v0 }
   0xd   :  { %364 = vmatpush.msrb.mxu1 %v14_v1  ;;  %430 = vmatpush.msrb.mxu2 %v14_v1 }
   0xe   :  { %299 = vmatpush.msrb.mxu0 %v13_v2  ;;  %496 = vmatpush.msrb.mxu3 %v14_v1 }
   0xf   :  { %365 = vmatpush.msrb.mxu1 %v13_v2  ;;  %431 = vmatpush.msrb.mxu2 %v13_v2 }
  0x10   :  { %300 = vmatpush.msrb.mxu0 %v12_v3  ;;  %497 = vmatpush.msrb.mxu3 %v13_v2 }
  0x11   :  { %366 = vmatpush.msrb.mxu1 %v12_v3  ;;  %432 = vmatpush.msrb.mxu2 %v12_v3 }
  0x12   :  { %498 = vmatpush.msrb.mxu3 %v12_v3 }
  0x86   :  { %v38_v6 = vpop.f32.mrf.mxu0 }
  0x87   :  { %v41_v7 = vadd.f32 %v38_v6, %v16_v5 }
  0x89   :  { %590 = vtanh.f32 %v41_v7  ;;  %v564_v9 = vmul.f32 -1.442695, %v41_v7 }
  0x8b   :  { %592 = vpow2.f32 %v564_v9 }
  0x8f   :  { %v591_v8 = vpop.eup %590 }
  0x90   :  { %64 = vrot.lane.b32.xlu0 %v591_v8, %s681_s18 }
  0x91   :  { %v593_v10 = vpop.eup %592 }
  0x92   :  { %v45_v11 = vadd.f32 1.0, %v593_v10 }
  0x94   :  { %594 = vrcp.f32 %v45_v11  ;;  %v57_v17 = vand.u32 2147483648, %v45_v11  ;;  %vm51_vm1 = vweird.f32 %v45_v11  ;;  %v55_v18 = vand.u32 2147483647, %v45_v11 }
  0x96   :  { %v58_v20 = vor.u32 1.1754944e-38, %v57_v17  ;;  %vm56_vm3 = vcmp.eq.f32.partialorder %v55_v18, 8.507059e+37 }
  0x9a   :  { %v595_v12 = vpop.eup %594 }
  0x9b   :  { %v47_v13 = vmul.f32 %v595_v12, %v45_v11  ;;  %vm52_vm0 = vweird.f32 %v595_v12 }
  0x9c   :  { %vm53_vm2 = vmor %vm51_vm1, %vm52_vm0 }
  0x9d   :  { %v48_v14 = vsub.f32 1.0, %v47_v13 }
  0x9f   :  { %v49_v15 = vmul.f32 %v595_v12, %v48_v14 }
  0xa1   :  { %v50_v16 = vadd.f32 %v595_v12, %v49_v15 }
  0xa3   :  { %v54_v19 = vsel %vm53_vm2, %v595_v12, %v50_v16 }
  0xa4   :  { %v59_v22 = vsel %vm56_vm3, %v58_v20, %v54_v19 }
  0xa5   :  { %v62_v24 = vmul.f32 0.0, %v59_v22 }
 0x102   :  { %v65_v21 = vpop.permute.xlu0 %64 }
 0x103   :  { %v67_v23 = vmul.f32 %v65_v21, %v59_v22  ;;  %v571_v21 = vld [vmem:[%s781_s0 + $0x6] sm:$0x3] }
 0x105   :  { %69 = vrot.lane.b32.xlu0 %v67_v23, %s682_s19 }
 0x177   :  { %v70_v25 = vpop.permute.xlu0 %69 }
 0x178   :  { %v72_v26 = vadd.f32 %v70_v25, %v62_v24 }
 0x17a   :  { %596 = vtanh.f32 %v72_v26 }
 0x180   :  { %v597_v27 = vpop.eup %596 }
 0x181   :  { %75 = vrot.lane.b32.xlu1 %v597_v27, %s681_s18 }
 0x1f3   :  { %v76_v28 = vpop.permute.xlu1 %75 }
 0x1f4   :  { %v717_v29 = vmul.f32 %v76_v28, %v59_v22 }
 0x1f6   :  { %83 = vrot.lane.b32.xlu1 %v717_v29, %s682_s19 }
 0x268   :  { %v84_v30 = vpop.permute.xlu1 %83 }
 0x269   :  { %566 = vmatmul.msk.f32.vlgmr.msra.gmra.mxu1 %vm17_vm4, %v84_v30 }
 0x2e6   :  { %v104_v32 = vpop.f32.mrf.mxu1 }
 0x2e7   :  { %v107_v33 = vadd.f32 %v565_v31, %v104_v32 }
 0x2e9   :  { %598 = vtanh.f32 %v107_v33  ;;  %v567_v35 = vmul.f32 -1.442695, %v107_v33 }
 0x2eb   :  { %600 = vpow2.f32 %v567_v35 }
 0x2ef   :  { %v599_v34 = vpop.eup %598 }
 0x2f0   :  { %130 = vrot.lane.b32.xlu2 %v599_v34, %s681_s18 }
 0x2f1   :  { %v601_v36 = vpop.eup %600 }
 0x2f2   :  { %v111_v37 = vadd.f32 1.0, %v601_v36 }
 0x2f4   :  { %602 = vrcp.f32 %v111_v37  ;;  %v123_v43 = vand.u32 2147483648, %v111_v37  ;;  %vm117_vm6 = vweird.f32 %v111_v37  ;;  %v121_v44 = vand.u32 2147483647, %v111_v37 }
 0x2f6   :  { %v124_v46 = vor.u32 1.1754944e-38, %v123_v43  ;;  %vm122_vm8 = vcmp.eq.f32.partialorder %v121_v44, 8.507059e+37 }
 0x2fa   :  { %v603_v38 = vpop.eup %602 }
 0x2fb   :  { %v113_v39 = vmul.f32 %v603_v38, %v111_v37  ;;  %vm118_vm5 = vweird.f32 %v603_v38 }
 0x2fc   :  { %vm119_vm7 = vmor %vm117_vm6, %vm118_vm5 }
 0x2fd   :  { %v114_v40 = vsub.f32 1.0, %v113_v39 }
 0x2ff   :  { %v115_v41 = vmul.f32 %v603_v38, %v114_v40 }
 0x301   :  { %v116_v42 = vadd.f32 %v603_v38, %v115_v41 }
 0x303   :  { %v120_v45 = vsel %vm119_vm7, %v603_v38, %v116_v42 }
 0x304   :  { %v125_v48 = vsel %vm122_vm8, %v124_v46, %v120_v45 }
 0x305   :  { %v128_v50 = vmul.f32 %v125_v48, %v72_v26 }
 0x34a   :  { %v131_v47 = vpop.permute.xlu2 %130 }
 0x34b   :  { %v133_v49 = vmul.f32 %v131_v47, %v125_v48 }
 0x34d   :  { %135 = vrot.lane.b32.xlu2 %v133_v49, %s682_s19 }
 0x3a7   :  { %v136_v51 = vpop.permute.xlu2 %135 }
 0x3a8   :  { %v138_v52 = vadd.f32 %v136_v51, %v128_v50 }
 0x3aa   :  { %604 = vtanh.f32 %v138_v52 }
 0x3b0   :  { %v605_v53 = vpop.eup %604 }
 0x3b1   :  { %141 = vrot.lane.b32.xlu0 %v605_v53, %s681_s18 }
 0x423   :  { %v142_v54 = vpop.permute.xlu0 %141 }
 0x424   :  { %v144_v55 = vmul.f32 %v142_v54, %v125_v48  ;;  %v574_v48 = vld [vmem:[%s781_s0 + $0x8] sm:$0x3] }
 0x426   :  { %149 = vrot.lane.b32.xlu1 %v144_v55, %s682_s19  ;;  %v145_v17 = vadd.f32 %v144_v55, %v717_v29 }
 0x498   :  { %v150_v56 = vpop.permute.xlu1 %149 }
 0x499   :  { %569 = vmatmul.msk.f32.vlgmr.msra.gmra.mxu2 %vm17_vm4, %v150_v56 }
 0x51c   :  { %v170_v58 = vpop.f32.mrf.mxu2 }
 0x51d   :  { %v173_v59 = vadd.f32 %v568_v57, %v170_v58 }
 0x51f   :  { %606 = vtanh.f32 %v173_v59  ;;  %v570_v61 = vmul.f32 -1.442695, %v173_v59 }
 0x521   :  { %608 = vpow2.f32 %v570_v61 }
 0x525   :  { %v607_v60 = vpop.eup %606 }
 0x526   :  { %196 = vrot.lane.b32.xlu2 %v607_v60, %s681_s18 }
 0x527   :  { %v609_v62 = vpop.eup %608 }
 0x528   :  { %v177_v63 = vadd.f32 1.0, %v609_v62 }
 0x52a   :  { %610 = vrcp.f32 %v177_v63  ;;  %v189_v5 = vand.u32 2147483648, %v177_v63  ;;  %vm183_vm10 = vweird.f32 %v177_v63  ;;  %v187_v6 = vand.u32 2147483647, %v177_v63 }
 0x52c   :  { %v190_v8 = vor.u32 1.1754944e-38, %v189_v5  ;;  %vm188_vm12 = vcmp.eq.f32.partialorder %v187_v6, 8.507059e+37 }
 0x530   :  { %v611_v0 = vpop.eup %610 }
 0x531   :  { %v179_v1 = vmul.f32 %v611_v0, %v177_v63  ;;  %vm184_vm9 = vweird.f32 %v611_v0 }
 0x532   :  { %vm185_vm11 = vmor %vm183_vm10, %vm184_vm9 }
 0x533   :  { %v180_v2 = vsub.f32 1.0, %v179_v1 }
 0x535   :  { %v181_v3 = vmul.f32 %v611_v0, %v180_v2 }
 0x537   :  { %v182_v4 = vadd.f32 %v611_v0, %v181_v3 }
 0x539   :  { %v186_v7 = vsel %vm185_vm11, %v611_v0, %v182_v4 }
 0x53a   :  { %v191_v10 = vsel %vm188_vm12, %v190_v8, %v186_v7 }
 0x53b   :  { %v194_v12 = vmul.f32 %v191_v10, %v138_v52 }
 0x580   :  { %v197_v9 = vpop.permute.xlu2 %196 }
 0x581   :  { %v199_v11 = vmul.f32 %v197_v9, %v191_v10 }
 0x583   :  { %201 = vrot.lane.b32.xlu0 %v199_v11, %s682_s19  ;;  %v577_v11 = vld [vmem:[%s781_s0 + $0xa] sm:$0x3] }
 0x5f5   :  { %v202_v13 = vpop.permute.xlu0 %201 }
 0x5f6   :  { %v204_v14 = vadd.f32 %v202_v13, %v194_v12 }
 0x5f8   :  { %612 = vtanh.f32 %v204_v14 }
 0x5fe   :  { %v613_v15 = vpop.eup %612 }
 0x5ff   :  { %207 = vrot.lane.b32.xlu1 %v613_v15, %s681_s18 }
 0x671   :  { %v208_v16 = vpop.permute.xlu1 %207 }
 0x672   :  { %v210_v18 = vmul.f32 %v208_v16, %v191_v10 }
 0x674   :  { %v211_v19 = vadd.f32 %v210_v18, %v145_v17  ;;  %215 = vrot.lane.b32.xlu2 %v210_v18, %s682_s19 }
 0x6ce   :  { %v216_v20 = vpop.permute.xlu2 %215 }
 0x6cf   :  { %572 = vmatmul.msk.f32.vlgmr.msra.gmra.mxu3 %vm17_vm4, %v216_v20 }
 0x752   :  { %v236_v22 = vpop.f32.mrf.mxu3 }
 0x753   :  { %v239_v23 = vadd.f32 %v571_v21, %v236_v22 }
 0x755   :  { %614 = vtanh.f32 %v239_v23  ;;  %v573_v25 = vmul.f32 -1.442695, %v239_v23 }
 0x757   :  { %616 = vpow2.f32 %v573_v25 }
 0x75b   :  { %v615_v24 = vpop.eup %614 }
 0x75c   :  { %262 = vrot.lane.b32.xlu0 %v615_v24, %s681_s18 }
 0x75d   :  { %v617_v26 = vpop.eup %616 }
 0x75e   :  { %v243_v27 = vadd.f32 1.0, %v617_v26 }
 0x760   :  { %618 = vrcp.f32 %v243_v27  ;;  %v255_v33 = vand.u32 2147483648, %v243_v27  ;;  %vm249_vm14 = vweird.f32 %v243_v27  ;;  %v253_v34 = vand.u32 2147483647, %v243_v27 }
 0x762   :  { %v256_v36 = vor.u32 1.1754944e-38, %v255_v33  ;;  %vm254_vm0 = vcmp.eq.f32.partialorder %v253_v34, 8.507059e+37 }
 0x766   :  { %v619_v28 = vpop.eup %618 }
 0x767   :  { %v245_v29 = vmul.f32 %v619_v28, %v243_v27  ;;  %vm250_vm13 = vweird.f32 %v619_v28 }
 0x768   :  { %vm251_vm15 = vmor %vm249_vm14, %vm250_vm13 }
 0x769   :  { %v246_v30 = vsub.f32 1.0, %v245_v29 }
 0x76b   :  { %v247_v31 = vmul.f32 %v619_v28, %v246_v30 }
 0x76d   :  { %v248_v32 = vadd.f32 %v619_v28, %v247_v31 }
 0x76f   :  { %v252_v35 = vsel %vm251_vm15, %v619_v28, %v248_v32 }
 0x770   :  { %v257_v38 = vsel %vm254_vm0, %v256_v36, %v252_v35 }
 0x771   :  { %v260_v40 = vmul.f32 %v257_v38, %v204_v14 }
 0x7ce   :  { %v263_v37 = vpop.permute.xlu0 %262 }
 0x7cf   :  { %v265_v39 = vmul.f32 %v263_v37, %v257_v38 }
 0x7d1   :  { %267 = vrot.lane.b32.xlu1 %v265_v39, %s682_s19 }
 0x843   :  { %v268_v41 = vpop.permute.xlu1 %267 }
 0x844   :  { %v270_v42 = vadd.f32 %v268_v41, %v260_v40 }
 0x846   :  { %620 = vtanh.f32 %v270_v42 }
 0x84c   :  { %v621_v43 = vpop.eup %620 }
 0x84d   :  { %273 = vrot.lane.b32.xlu2 %v621_v43, %s681_s18 }
 0x8a7   :  { %v274_v44 = vpop.permute.xlu2 %273 }
 0x8a8   :  { %v276_v45 = vmul.f32 %v274_v44, %v257_v38  ;;  %v580_v38 = vld [vmem:[%s781_s0 + $0xc] sm:$0x3] }
 0x8aa   :  { %v277_v46 = vadd.f32 %v276_v45, %v211_v19  ;;  %281 = vrot.lane.b32.xlu0 %v276_v45, %s682_s19 }
 0x91c   :  { %v282_v47 = vpop.permute.xlu0 %281 }
 0x91d   :  { %575 = vmatmul.msk.f32.vlgmr.msrb.gmra.mxu0 %vm17_vm4, %v282_v47 }
 0x99a   :  { %v302_v49 = vpop.f32.mrf.mxu0 }
 0x99b   :  { %v305_v50 = vadd.f32 %v574_v48, %v302_v49 }
 0x99d   :  { %622 = vtanh.f32 %v305_v50  ;;  %v576_v52 = vmul.f32 -1.442695, %v305_v50 }
 0x99f   :  { %624 = vpow2.f32 %v576_v52 }
 0x9a3   :  { %v623_v51 = vpop.eup %622 }
 0x9a4   :  { %328 = vrot.lane.b32.xlu1 %v623_v51, %s681_s18 }
 0x9a5   :  { %v625_v53 = vpop.eup %624 }
 0x9a6   :  { %v309_v54 = vadd.f32 1.0, %v625_v53 }
 0x9a8   :  { %626 = vrcp.f32 %v309_v54  ;;  %v321_v60 = vand.u32 2147483648, %v309_v54  ;;  %vm315_vm2 = vweird.f32 %v309_v54  ;;  %v319_v61 = vand.u32 2147483647, %v309_v54 }
 0x9aa   :  { %v322_v63 = vor.u32 1.1754944e-38, %v321_v60  ;;  %vm320_vm5 = vcmp.eq.f32.partialorder %v319_v61, 8.507059e+37 }
 0x9ae   :  { %v627_v55 = vpop.eup %626 }
 0x9af   :  { %v311_v56 = vmul.f32 %v627_v55, %v309_v54  ;;  %vm316_vm1 = vweird.f32 %v627_v55 }
 0x9b0   :  { %vm317_vm3 = vmor %vm315_vm2, %vm316_vm1  ;;  %vm546_vm1 = vcmask 254976  }
 0x9b1   :  { %v312_v57 = vsub.f32 1.0, %v311_v56 }
 0x9b3   :  { %v313_v58 = vmul.f32 %v627_v55, %v312_v57 }
 0x9b5   :  { %v314_v59 = vadd.f32 %v627_v55, %v313_v58 }
 0x9b7   :  { %v318_v62 = vsel %vm317_vm3, %v627_v55, %v314_v59 }
 0x9b8   :  { %v323_v1 = vsel %vm320_vm5, %v322_v63, %v318_v62 }
 0x9b9   :  { %v326_v3 = vmul.f32 %v323_v1, %v270_v42 }
 0xa16   :  { %v329_v0 = vpop.permute.xlu1 %328 }
 0xa17   :  { %v331_v2 = vmul.f32 %v329_v0, %v323_v1 }
 0xa19   :  { %333 = vrot.lane.b32.xlu2 %v331_v2, %s682_s19 }
 0xa73   :  { %v334_v4 = vpop.permute.xlu2 %333 }
 0xa74   :  { %v336_v5 = vadd.f32 %v334_v4, %v326_v3 }
 0xa76   :  { %628 = vtanh.f32 %v336_v5 }
 0xa7c   :  { %v629_v6 = vpop.eup %628 }
 0xa7d   :  { %339 = vrot.lane.b32.xlu0 %v629_v6, %s681_s18 }
 0xaef   :  { %v340_v7 = vpop.permute.xlu0 %339 }
 0xaf0   :  { %v342_v8 = vmul.f32 %v340_v7, %v323_v1  ;;  %v583_v1 = vld [vmem:[%s781_s0 + $0xe] sm:$0x3]  ;;  %s683_s0 = smov [#allocation2]  }
 0xaf1   :  { %s553_s6 = sshll.u32 %s683_s0, 4  ;;  %s554_s6 = int_to_ptr.vmem [resolvable:$true] %s553_s6 }
 0xaf2   :  { %v343_v9 = vadd.f32 %v342_v8, %v277_v46  ;;  %347 = vrot.lane.b32.xlu1 %v342_v8, %s682_s19 }
 0xb64   :  { %v348_v10 = vpop.permute.xlu1 %347 }
 0xb65   :  { %578 = vmatmul.msk.f32.vlgmr.msrb.gmra.mxu1 %vm17_vm4, %v348_v10 }
 0xbe2   :  { %v368_v12 = vpop.f32.mrf.mxu1 }
 0xbe3   :  { %v371_v13 = vadd.f32 %v577_v11, %v368_v12 }
 0xbe5   :  { %630 = vtanh.f32 %v371_v13  ;;  %v579_v15 = vmul.f32 -1.442695, %v371_v13 }
 0xbe7   :  { %632 = vpow2.f32 %v579_v15 }
 0xbeb   :  { %v631_v14 = vpop.eup %630 }
 0xbec   :  { %394 = vrot.lane.b32.xlu2 %v631_v14, %s681_s18 }
 0xbed   :  { %v633_v16 = vpop.eup %632 }
 0xbee   :  { %v375_v17 = vadd.f32 1.0, %v633_v16 }
 0xbf0   :  { %634 = vrcp.f32 %v375_v17  ;;  %v387_v23 = vand.u32 2147483648, %v375_v17  ;;  %vm381_vm7 = vweird.f32 %v375_v17  ;;  %v385_v24 = vand.u32 2147483647, %v375_v17 }
 0xbf2   :  { %v388_v26 = vor.u32 1.1754944e-38, %v387_v23  ;;  %vm386_vm9 = vcmp.eq.f32.partialorder %v385_v24, 8.507059e+37 }
 0xbf6   :  { %v635_v18 = vpop.eup %634 }
 0xbf7   :  { %v377_v19 = vmul.f32 %v635_v18, %v375_v17  ;;  %vm382_vm6 = vweird.f32 %v635_v18 }
 0xbf8   :  { %vm383_vm8 = vmor %vm381_vm7, %vm382_vm6 }
 0xbf9   :  { %v378_v20 = vsub.f32 1.0, %v377_v19 }
 0xbfb   :  { %v379_v21 = vmul.f32 %v635_v18, %v378_v20 }
 0xbfd   :  { %v380_v22 = vadd.f32 %v635_v18, %v379_v21 }
 0xbff   :  { %v384_v25 = vsel %vm383_vm8, %v635_v18, %v380_v22 }
 0xc00   :  { %v389_v28 = vsel %vm386_vm9, %v388_v26, %v384_v25 }
 0xc01   :  { %v392_v30 = vmul.f32 %v389_v28, %v336_v5 }
 0xc46   :  { %v395_v27 = vpop.permute.xlu2 %394 }
 0xc47   :  { %v397_v29 = vmul.f32 %v395_v27, %v389_v28 }
 0xc49   :  { %399 = vrot.lane.b32.xlu0 %v397_v29, %s682_s19 }
 0xcbb   :  { %v400_v31 = vpop.permute.xlu0 %399 }
 0xcbc   :  { %v402_v32 = vadd.f32 %v400_v31, %v392_v30 }
 0xcbe   :  { %636 = vtanh.f32 %v402_v32 }
 0xcc4   :  { %v637_v33 = vpop.eup %636 }
 0xcc5   :  { %405 = vrot.lane.b32.xlu1 %v637_v33, %s681_s18 }
 0xd37   :  { %v406_v34 = vpop.permute.xlu1 %405 }
 0xd38   :  { %v408_v35 = vmul.f32 %v406_v34, %v389_v28 }
 0xd3a   :  { %v409_v36 = vadd.f32 %v408_v35, %v343_v9  ;;  %413 = vrot.lane.b32.xlu2 %v408_v35, %s682_s19 }
 0xd94   :  { %v414_v37 = vpop.permute.xlu2 %413 }
 0xd95   :  { %581 = vmatmul.msk.f32.vlgmr.msrb.gmra.mxu2 %vm17_vm4, %v414_v37 }
 0xe18   :  { %v434_v39 = vpop.f32.mrf.mxu2 }
 0xe19   :  { %v437_v40 = vadd.f32 %v580_v38, %v434_v39 }
 0xe1b   :  { %638 = vtanh.f32 %v437_v40  ;;  %v582_v42 = vmul.f32 -1.442695, %v437_v40 }
 0xe1d   :  { %640 = vpow2.f32 %v582_v42 }
 0xe21   :  { %v639_v41 = vpop.eup %638 }
 0xe22   :  { %460 = vrot.lane.b32.xlu0 %v639_v41, %s681_s18 }
 0xe23   :  { %v641_v43 = vpop.eup %640 }
 0xe24   :  { %v441_v44 = vadd.f32 1.0, %v641_v43 }
 0xe26   :  { %642 = vrcp.f32 %v441_v44  ;;  %v453_v50 = vand.u32 2147483648, %v441_v44  ;;  %vm447_vm11 = vweird.f32 %v441_v44  ;;  %v451_v51 = vand.u32 2147483647, %v441_v44 }
 0xe28   :  { %v454_v53 = vor.u32 1.1754944e-38, %v453_v50  ;;  %vm452_vm13 = vcmp.eq.f32.partialorder %v451_v51, 8.507059e+37 }
 0xe2c   :  { %v643_v45 = vpop.eup %642 }
 0xe2d   :  { %v443_v46 = vmul.f32 %v643_v45, %v441_v44  ;;  %vm448_vm10 = vweird.f32 %v643_v45 }
 0xe2e   :  { %vm449_vm12 = vmor %vm447_vm11, %vm448_vm10 }
 0xe2f   :  { %v444_v47 = vsub.f32 1.0, %v443_v46 }
 0xe31   :  { %v445_v48 = vmul.f32 %v643_v45, %v444_v47 }
 0xe33   :  { %v446_v49 = vadd.f32 %v643_v45, %v445_v48 }
 0xe35   :  { %v450_v52 = vsel %vm449_vm12, %v643_v45, %v446_v49 }
 0xe36   :  { %v455_v55 = vsel %vm452_vm13, %v454_v53, %v450_v52 }
 0xe37   :  { %v458_v57 = vmul.f32 %v455_v55, %v402_v32 }
 0xe94   :  { %v461_v54 = vpop.permute.xlu0 %460 }
 0xe95   :  { %v463_v56 = vmul.f32 %v461_v54, %v455_v55 }
 0xe97   :  { %465 = vrot.lane.b32.xlu1 %v463_v56, %s682_s19 }
 0xf09   :  { %v466_v58 = vpop.permute.xlu1 %465 }
 0xf0a   :  { %v468_v59 = vadd.f32 %v466_v58, %v458_v57 }
 0xf0c   :  { %644 = vtanh.f32 %v468_v59 }
 0xf12   :  { %v645_v60 = vpop.eup %644 }
 0xf13   :  { %471 = vrot.lane.b32.xlu2 %v645_v60, %s681_s18 }
 0xf6d   :  { %v472_v61 = vpop.permute.xlu2 %471 }
 0xf6e   :  { %v474_v62 = vmul.f32 %v472_v61, %v455_v55 }
 0xf70   :  { %v475_v63 = vadd.f32 %v474_v62, %v409_v36  ;;  %479 = vrot.lane.b32.xlu0 %v474_v62, %s682_s19 }
 0xfe2   :  { %v480_v0 = vpop.permute.xlu0 %479 }
 0xfe3   :  { %584 = vmatmul.msk.f32.vlgmr.msrb.gmra.mxu3 %vm17_vm4, %v480_v0 }
0x1066   :  { %v500_v2 = vpop.f32.mrf.mxu3 }
0x1067   :  { %v503_v3 = vadd.f32 %v583_v1, %v500_v2 }
0x1069   :  { %646 = vtanh.f32 %v503_v3  ;;  %v585_v5 = vmul.f32 -1.442695, %v503_v3 }
0x106b   :  { %648 = vpow2.f32 %v585_v5 }
0x106f   :  { %v647_v4 = vpop.eup %646 }
0x1070   :  { %526 = vrot.lane.b32.xlu1 %v647_v4, %s681_s18 }
0x1071   :  { %v649_v6 = vpop.eup %648 }
0x1072   :  { %v507_v7 = vadd.f32 1.0, %v649_v6 }
0x1074   :  { %650 = vrcp.f32 %v507_v7  ;;  %v519_v13 = vand.u32 2147483648, %v507_v7  ;;  %vm513_vm14 = vweird.f32 %v507_v7  ;;  %v517_v14 = vand.u32 2147483647, %v507_v7 }
0x1076   :  { %v520_v16 = vor.u32 1.1754944e-38, %v519_v13  ;;  %vm518_vm0 = vcmp.eq.f32.partialorder %v517_v14, 8.507059e+37 }
0x107a   :  { %v651_v8 = vpop.eup %650 }
0x107b   :  { %v509_v9 = vmul.f32 %v651_v8, %v507_v7  ;;  %vm514_vm4 = vweird.f32 %v651_v8 }
0x107c   :  { %vm515_vm15 = vmor %vm513_vm14, %vm514_vm4 }
0x107d   :  { %v510_v10 = vsub.f32 1.0, %v509_v9 }
0x107f   :  { %v511_v11 = vmul.f32 %v651_v8, %v510_v10 }
0x1081   :  { %v512_v12 = vadd.f32 %v651_v8, %v511_v11 }
0x1083   :  { %v516_v15 = vsel %vm515_vm15, %v651_v8, %v512_v12 }
0x1084   :  { %v521_v18 = vsel %vm518_vm0, %v520_v16, %v516_v15 }
0x1085   :  { %v524_v20 = vmul.f32 %v521_v18, %v468_v59 }
0x10e2   :  { %v527_v17 = vpop.permute.xlu1 %526 }
0x10e3   :  { %v529_v19 = vmul.f32 %v527_v17, %v521_v18 }
0x10e5   :  { %531 = vrot.lane.b32.xlu2 %v529_v19, %s682_s19 }
0x113f   :  { %v532_v21 = vpop.permute.xlu2 %531 }
0x1140   :  { %v534_v22 = vadd.f32 %v532_v21, %v524_v20 }
0x1142   :  { %652 = vtanh.f32 %v534_v22 }
0x1148   :  { %v653_v23 = vpop.eup %652 }
0x1149   :  { %537 = vrot.lane.b32.xlu0 %v653_v23, %s681_s18 }
0x11bb   :  { %v538_v24 = vpop.permute.xlu0 %537 }
0x11bc   :  { %v540_v25 = vmul.f32 %v538_v24, %v521_v18 }
0x11be   :  { %v541_v26 = vadd.f32 %v540_v25, %v475_v63 }
0x11c0   :  { %543 = vrot.lane.b32.xlu1 %v541_v26, %s682_s19 }
0x1232   :  { %v544_v27 = vpop.permute.xlu1 %543 }
0x1233   :  { %547 = vst.msk [vmem:[#allocation2] sm:$0x3] %vm546_vm1, %v544_v27 }
0x1234   :  { %558 = dma.vmem_to_hbm [thread:$0]  %s554_s6, 32, %s556_s9, [#allocation3]  }
0x1235   :  { %678 = dma.done.wait [#allocation3], 32  }
0x1236   :  { %679 = vsyncadd [#allocation3], 4294967264 }
0x1237   :  { %563 = vsyncpa [#allocation3], 1 }

</bundles_post_ra>
